<compile_context>
chip_gen: v5e
topology: v5e:2x2
jax: 0.10.0
libtpu: 0.0.40
codegen_flags: <defaults>
</compile_context>

<pallas_src>
import jax
import jax.numpy as jnp
from jax.experimental import pallas as pl
from jax.experimental.pallas import tpu as pltpu


# ----------------------------------------------------------------------------
# Constant reports / vocab setup (deterministic, in-script)
# ----------------------------------------------------------------------------
_IU_DUMMY_REPORT = (
    'the heart is normal in size . the mediastinum is unremarkable .\n'
    'the lungs are clear .\n'
    'there is no pneumothorax or pleural effusion . no focal airspace disease .\n'
    'no pleural effusion or pneumothorax . END'
)

_CONSTANT_REPORTS = {'iu': _IU_DUMMY_REPORT}

PAD_IDX = 0
START_IDX = 1
END_IDX = 2
UNK_IDX = 3


def _build_vocab(report_text):
    """Deterministic synthetic vocab: special tokens + sorted report words."""
    vocab = {'PAD': PAD_IDX, 'START': START_IDX, 'END': END_IDX, 'UNK': UNK_IDX}
    for word in sorted(set(report_text.split())):
        if word not in vocab:
            vocab[word] = len(vocab)
    return vocab


def _report_to_list(dummy_report, vocab):
    words = dummy_report.split()
    return [vocab[w] for w in words if w in vocab]


# ----------------------------------------------------------------------------
# Pallas kernel: lane-dense broadcast store of the constant one-hot row
# ----------------------------------------------------------------------------
def _broadcast_store_kernel(row_ref, out_ref):
    # row_ref: VMEM (1, F) float32        -- flattened constant one-hot report
    # out_ref: VMEM (B_TILE, F) float32   -- lane-dense output block
    out_ref[...] = jnp.broadcast_to(row_ref[...], out_ref.shape)


def _get_vmem_capacity_bytes():
    """Per-generation physical VMEM (v5e/v6e: 128 MiB, v7x: 64 MiB)."""
    try:
        return int(pltpu.get_tpu_info().vmem_capacity_bytes)
    except Exception:
        return 64 * 1024 * 1024  # conservative fallback (v7x per-core)


def _choose_batch_tile(batch_size, flat_width, vmem_cap_bytes):
    """Pick a legal, large batch tile.

    Rules enforced:
      * b_tile == batch_size (full-dim block), or b_tile is a multiple of 8
        (f32 sublane height) -> satisfies the (8,128) BlockSpec constraint.
      * target ~8 MiB blocks, capped so 2x block (double-buffered output)
        stays well under the chip's VMEM (v7x has only 64 MiB).
      * prefer a divisor of batch_size so there is no ragged masked tail.
    """
    bytes_per_row = max(flat_width * 4, 1)
    target_block_bytes = max(min(8 << 20, vmem_cap_bytes // 8), bytes_per_row)
    rows = max(1, target_block_bytes // bytes_per_row)

    if rows >= batch_size:
        return batch_size  # single full-batch block (full dim -> always legal)

    b_tile = max(8, (rows // 8) * 8)
    if b_tile >= batch_size:
        return batch_size

    # Prefer a multiple-of-8 divisor of batch_size (no ragged final block).
    for cand in range(b_tile, 7, -8):
        if batch_size % cand == 0:
            return cand
    return b_tile  # ragged tail handled correctly by Pallas masking


def constant_report_onehot(tokens, batch_size, vocab_size):
    """Repeat the constant one-hot report over the batch via a Pallas kernel."""
    n_words = tokens.shape[0]
    flat_width = n_words * vocab_size

    # Constant across the batch -> compute the one-hot ONCE (plain JAX); the
    # kernel is then purely HBM-writeback bound (its true roofline).
    vocab_ids = jax.lax.broadcasted_iota(jnp.int32, (n_words, vocab_size), 1)
    onehot_row = (tokens.astype(jnp.int32)[:, None] == vocab_ids).astype(jnp.float32)
    onehot_row = onehot_row.reshape(1, flat_width)

    vmem_cap = _get_vmem_capacity_bytes()
    b_tile = _choose_batch_tile(batch_size, flat_width, vmem_cap)
    grid = (pl.cdiv(batch_size, b_tile),)

    # Scoped-VMEM budget: double-buffered output block + double-buffered input
    # row + margin. v5e's 16 MiB default would reject ~8 MiB blocks otherwise.
    bytes_per_row = flat_width * 4
    block_bytes = b_tile * bytes_per_row
    vmem_limit = max(2 * block_bytes + 2 * bytes_per_row + (2 << 20), 16 << 20)

    out_bytes = batch_size * flat_width * 4
    cost = pl.CostEstimate(
        flops=0,
        transcendentals=0,
        bytes_accessed=out_bytes + flat_width * 4,
    )

    out_flat = pl.pallas_call(
        _broadcast_store_kernel,
        out_shape=jax.ShapeDtypeStruct((batch_size, flat_width), jnp.float32),
        grid_spec=pltpu.PrefetchScalarGridSpec(
            num_scalar_prefetch=0,
            grid=grid,
            in_specs=[
                # Same constant block for every grid step (no re-DMA needed).
                pl.BlockSpec((1, flat_width), lambda b: (0, 0)),
            ],
            out_specs=pl.BlockSpec((b_tile, flat_width), lambda b: (b, 0)),
        ),
        compiler_params=pltpu.CompilerParams(
            dimension_semantics=("parallel",),
            vmem_limit_bytes=int(vmem_limit),
        ),
        cost_estimate=cost,
    )(onehot_row)

    # Free metadata reshape back to the torch one_hot layout.
    return out_flat.reshape(batch_size, n_words, vocab_size)


# ----------------------------------------------------------------------------
# Module wrapper mirroring ConstantReport.forward
# ----------------------------------------------------------------------------
class ConstantReportPallas:
    def __init__(self, vocab, version='iu'):
        report = _CONSTANT_REPORTS[version]
        self.report = _report_to_list(report, vocab)
        self.vocab_size = len(vocab)
        if self.report[-1] != END_IDX:
            self.report.append(END_IDX)

    def forward(self, images, reports=None, free=False, **unused_kwargs):
        batch_size = images.shape[0]
        base_report = list(self.report)
        if reports is None or free:
            n_words = len(base_report)
        else:
            n_words = reports.shape[-1]
        missing = n_words - len(base_report)
        if missing > 0:
            base_report += [PAD_IDX] * missing
        elif missing < 0:
            base_report = base_report[:n_words]

        tokens = jnp.asarray(base_report, dtype=jnp.int32)
        out = constant_report_onehot(tokens, batch_size, self.vocab_size)
        return (out,)


# ----------------------------------------------------------------------------
# Main
# ----------------------------------------------------------------------------
if __name__ == "__main__":
    key = jax.random.PRNGKey(0)
    # images: NCHW, only the batch dim is used by the model (as in PyTorch).
    images = jax.random.normal(key, (2, 4, 16, 16), dtype=jnp.float32)

    vocab = _build_vocab(_IU_DUMMY_REPORT)
    model = ConstantReportPallas(vocab, version='iu')

    (reports_onehot,) = model.forward(images)
    reports_onehot = jax.block_until_ready(reports_onehot)

    # Lightweight sanity check against pure-JAX reference (not a benchmark).
    base = jnp.asarray(model.report, dtype=jnp.int32)
    ref = jax.nn.one_hot(jnp.tile(base[None, :], (images.shape[0], 1)),
                         model.vocab_size, dtype=jnp.float32)
    assert reports_onehot.shape == ref.shape
    assert bool(jnp.all(reports_onehot == ref))

    # Also exercise the truncate/pad path (reports given, free=False).
    fake_reports = jnp.zeros((images.shape[0], 8), dtype=jnp.int32)
    (short_out,) = model.forward(images, reports=fake_reports)
    short_out = jax.block_until_ready(short_out)
    ref_short = jax.nn.one_hot(jnp.tile(base[:8][None, :], (images.shape[0], 1)),
                               model.vocab_size, dtype=jnp.float32)
    assert short_out.shape == ref_short.shape
    assert bool(jnp.all(short_out == ref_short))

    print("KERNEL_OK")
</pallas_src>

<mosaic_0001>
module attributes {stable_mosaic.version = 11 : i64} {
  func.func @_broadcast_store_kernel(%arg0: i32, %arg1: memref<1x925xf32, #tpu.memory_space<vmem>>, %arg2: memref<2x925xf32, #tpu.memory_space<vmem>>) attributes {dimension_semantics = [#tpu.dimension_semantics<parallel>], iteration_bounds = array<i64: 1>, scalar_prefetch = 0 : i64, scratch_operands = 0 : i64, tpu.core_type = #tpu.core_type<tc>, window_params = [{pipeline_mode = #tpu.pipeline_mode<synchronous>, transform_indices = @transform_0, window_bounds = array<i64: 1, 925>}, {transform_indices = @transform_1, window_bounds = array<i64: 2, 925>}]} {
    %c0 = arith.constant 0 : index
    %c0_0 = arith.constant 0 : index
    %0 = vector.load %arg1[%c0, %c0_0] : memref<1x925xf32, #tpu.memory_space<vmem>>, vector<1x925xf32>
    %1 = vector.shape_cast %0 : vector<1x925xf32> to vector<1x925xf32>
    %2 = vector.broadcast %1 : vector<1x925xf32> to vector<2x925xf32>
    %c0_1 = arith.constant 0 : index
    %c0_2 = arith.constant 0 : index
    %3 = vector.load %arg2[%c0_1, %c0_2] : memref<2x925xf32, #tpu.memory_space<vmem>>, vector<2x925xf32>
    tpu.vector_store %arg2[%c0_1, %c0_2], %2 {strides = array<i32>} : memref<2x925xf32, #tpu.memory_space<vmem>>, vector<2x925xf32>,
    return
  }
  func.func @transform_0(%arg0: i32) -> (i32, i32) {
    %c0_i32 = arith.constant 0 : i32
    %c0_i32_0 = arith.constant 0 : i32
    %c0_i32_1 = arith.constant 0 : i32
    return %c0_i32, %c0_i32_0 : i32, i32
  }
  func.func @transform_1(%arg0: i32) -> (i32, i32) {
    %c0_i32 = arith.constant 0 : i32
    %c0_i32_0 = arith.constant 0 : i32
    return %arg0, %c0_i32 : i32, i32
  }
}

</mosaic_0001>

<bundles_post_ra>
// kernel: tpu_custom_call.1
= control target key start
LH: loop header
LB: loop body
LE: loop exit
PB: predicated region body
PF: predicated region fallthrough
CT: control target
= control target key end

     0   :  { %6 = vsyncpa [#allocation3], 0  ;;  %s155_s0 = inlined_call_operand.hbm [shape: f32[1,925], index: 0, kind: input, shape index: {}]   ;;  %s156_s1 = inlined_call_operand.hbm [shape: f32[2,925], index: 1, kind: output, shape index: {}]  }
   0x1   :  { %7 = vsyncpa [#allocation4], 0  ;;  %s13_s8 = sshll.u32 %s155_s0, 4  ;;  %s128_s9 = smov [#allocation2]   ;;  %s14_s8 = int_to_ptr.hbm [resolvable:$true] %s13_s8 }
   0x2   :  { %s15_s10 = sshll.u32 %s128_s9, 4  ;;  %s16_s10 = int_to_ptr.vmem [resolvable:$true] %s15_s10 }
   0x3   :  { %18 = dma.hbm_to_vmem [thread:$0]  %s14_s8, 128, %s16_s10, [#allocation3]  }
   0x4   :  { %124 = dma.done.wait [#allocation3], 128  }
   0x5   :  { %125 = vsyncadd [#allocation3], 4294967168  ;;  %vm39_vm0 = vcmask 1041408   ;;  %vm51_vm1 = vcmask 1043458   ;;  %vm41_vm2 = vcmask 1045508   ;;  %v23_v0 = vld [vmem:[#allocation2] sm:$0xff] }
   0x6   :  { %vm52_vm3 = vmor %vm51_vm1, %vm39_vm0  ;;  %vm54_vm4 = vcmask 236550   ;;  %v25_v1 = vperm.slane %v23_v0, 0  ;;  %v26_v2 = vperm.slane %v23_v0, 1  ;;  %v27_v3 = vperm.slane %v23_v0, 2  ;;  %s129_s0 = smov [#allocation5]   ;;  %s64_s14 = sshll.u32 %s156_s1, 4  ;;  %s65_s14 = int_to_ptr.hbm [resolvable:$true] %s64_s14 }
   0x7   :  { %v28_v4 = vperm.slane %v23_v0, 3  ;;  %v29_v5 = vperm.slane %v23_v0, 4  ;;  %v30_v6 = vperm.slane %v23_v0, 5  ;;  %v31_v7 = vperm.slane %v23_v0, 6  ;;  %vm53_vm5 = vmor %vm41_vm2, %vm52_vm3  ;;  %s62_s11 = sshll.u32 %s129_s0, 4  ;;  %s63_s11 = int_to_ptr.vmem [resolvable:$true] %s62_s11 }
   0x8   :  { %v32_v8 = vperm.slane %v23_v0, 7  ;;  %v33_v9 = vrot.slane %v26_v2, 6  ;;  %v34_v10 = vrot.slane %v27_v3, 4  ;;  %vm43_vm6 = vcmask 1043456   ;;  %vm55_vm7 = vmor %vm54_vm4, %vm53_vm5 }
   0x9   :  { %v35_v11 = vrot.slane %v28_v4, 2  ;;  %v36_v12 = vrot.slane %v30_v6, 6  ;;  %v37_v13 = vrot.slane %v31_v7, 4 }
   0xa   :  { %v38_v14 = vrot.slane %v32_v8, 2  ;;  %v40_v15 = vsel %vm39_vm0, %v25_v1, %v33_v9 }
   0xb   :  { %v42_v16 = vsel %vm41_vm2, %v34_v10, %v35_v11  ;;  %v45_v18 = vsel %vm39_vm0, %v29_v5, %v36_v12 }
   0xc   :  { %v44_v17 = vsel %vm43_vm6, %v40_v15, %v42_v16  ;;  %v46_v19 = vsel %vm41_vm2, %v37_v13, %v38_v14 }
   0xd   :  { %50 = vst [vmem:[#allocation5] sm:$0xff] %v44_v17  ;;  %v47_v20 = vsel %vm43_vm6, %v45_v18, %v46_v19 }
   0xe   :  { %56 = vst.msk [vmem:[#allocation5 + $0x8] sm:$0xff] %vm55_vm7, %v47_v20 }
   0xf   :  { %67 = dma.vmem_to_hbm [thread:$0]  %s63_s11, 256, %s65_s14, [#allocation4]  }
  0x10   :  { %126 = dma.done.wait [#allocation4], 256  }
  0x11   :  { %127 = vsyncadd [#allocation4], 4294967040 }
  0x12   :  { %72 = vsyncpa [#allocation3], 1 }
  0x13   :  { %73 = vsyncpa [#allocation4], 1 }

</bundles_post_ra>
